<compile_context>
chip_gen: v5e
topology: v5e:2x2
jax: 0.10.0
libtpu: 0.0.40
codegen_flags: <defaults>
</compile_context>

<pallas_src>
import functools

import jax
import jax.numpy as jnp
from jax.experimental import pallas as pl
from jax.experimental.pallas import tpu as pltpu

LOG_STD_MAX = 2.0
LOG_STD_MIN = -5.0
_LOGSTD_SCALE = 0.5 * (LOG_STD_MAX - LOG_STD_MIN)      # 3.5
_LOGSTD_OFFSET = LOG_STD_MIN + _LOGSTD_SCALE           # -1.5
HIDDEN = 256


def _round_up(x, m):
    return (x + m - 1) // m * m


def actor_kernel(x_ref, w1_ref, b1_ref, w2_ref, b2_ref, wh_ref, bh_ref,
                 out_ref, *, act_pad):
    # fc1 + relu (bf16 operands, f32 MXU accumulation; hidden carried as bf16)
    h = jnp.dot(x_ref[...].astype(jnp.bfloat16), w1_ref[...],
                preferred_element_type=jnp.float32)
    h = jnp.maximum(h + b1_ref[...], 0.0).astype(jnp.bfloat16)
    # fc2 + relu
    h = jnp.dot(h, w2_ref[...], preferred_element_type=jnp.float32)
    h = jnp.maximum(h + b2_ref[...], 0.0).astype(jnp.bfloat16)
    # fused {mean, log_std} heads: one matmul, lane-aligned split at act_pad
    y = jnp.dot(h, wh_ref[...], preferred_element_type=jnp.float32) + bh_ref[...]
    mean = y[:, :act_pad]
    log_std = _LOGSTD_OFFSET + _LOGSTD_SCALE * jnp.tanh(y[:, act_pad:])
    # Single lane-packed output slab (both halves 128-lane aligned).
    out_ref[:, :act_pad] = mean.astype(out_ref.dtype)
    out_ref[:, act_pad:] = log_std.astype(out_ref.dtype)


def prepare_actor_params(params):
    """One-time param prep: fuse + lane-pad the two heads, cast weights to bf16."""
    act_dim = params["wm"].shape[1]
    act_pad = _round_up(max(act_dim, 1), 128)

    def pad_cols(a, n):
        return jnp.pad(a, ((0, 0), (0, n - a.shape[1])))

    wh = jnp.concatenate([pad_cols(params["wm"], act_pad),
                          pad_cols(params["wl"], act_pad)], axis=1)
    bh = jnp.concatenate([pad_cols(params["bm"], act_pad),
                          pad_cols(params["bl"], act_pad)], axis=1)
    return dict(
        w1=params["w1"].astype(jnp.bfloat16),
        b1=params["b1"].astype(jnp.float32),
        w2=params["w2"].astype(jnp.bfloat16),
        b2=params["b2"].astype(jnp.float32),
        wh=wh.astype(jnp.bfloat16),
        bh=bh.astype(jnp.float32),
        act_dim=act_dim,
        act_pad=act_pad,
    )


def actor_forward(x, prepped, *, tb_max=4096, out_dtype=jnp.float32):
    """Actor forward pass.

    x: (B, obs_dim) float32
    prepped: output of prepare_actor_params
    returns: (mean (B, act_dim), log_std (B, act_dim)), dtype out_dtype
    """
    B, obs_dim = x.shape
    act_dim = prepped["act_dim"]
    act_pad = prepped["act_pad"]
    hidden = prepped["w1"].shape[1]

    # Batch tile: multiple of 8 sublanes, >=2 grid steps when possible (v7x
    # megacore), capped at tb_max. Partial last block is masked by Pallas.
    tb = min(tb_max, max(8, _round_up(pl.cdiv(B, 2), 8)))
    grid = (pl.cdiv(B, tb),)

    x_spec = pl.BlockSpec((tb, obs_dim), lambda i: (i, 0))
    out_spec = pl.BlockSpec((tb, 2 * act_pad), lambda i: (i, 0))

    def resident(shape):
        # Weights/biases: constant index_map -> stay resident in VMEM.
        return pl.BlockSpec(shape, lambda i: (0, 0))

    out_itemsize = jnp.dtype(out_dtype).itemsize
    vmem_est = (
        2 * tb * obs_dim * 4                                    # x double-buffer
        + 2 * tb * 2 * act_pad * out_itemsize                   # out double-buffer
        + 2 * ((obs_dim + hidden) * hidden + hidden * 2 * act_pad)  # bf16 weights
        + 4 * (2 * hidden + 2 * act_pad)                        # f32 biases
        + 2 * tb * hidden * 4                                   # hidden activation headroom
    )
    vmem_limit = min(56 << 20, vmem_est + (8 << 20))            # safe on v7x's 64 MiB

    kernel = functools.partial(actor_kernel, act_pad=act_pad)
    slab = pl.pallas_call(
        kernel,
        out_shape=jax.ShapeDtypeStruct((B, 2 * act_pad), out_dtype),
        grid=grid,
        in_specs=[
            x_spec,
            resident((obs_dim, hidden)), resident((1, hidden)),
            resident((hidden, hidden)), resident((1, hidden)),
            resident((hidden, 2 * act_pad)), resident((1, 2 * act_pad)),
        ],
        out_specs=out_spec,
        compiler_params=pltpu.CompilerParams(
            dimension_semantics=("parallel",),
            vmem_limit_bytes=int(vmem_limit)),
    )(x, prepped["w1"], prepped["b1"], prepped["w2"], prepped["b2"],
      prepped["wh"], prepped["bh"])

    mean = slab[:, :act_dim]
    log_std = slab[:, act_pad:act_pad + act_dim]
    return mean, log_std


def init_params(key, obs_dim, act_dim, hidden=HIDDEN):
    ks = jax.random.split(key, 8)

    def lin(kw, kb, fan_in, fan_out):
        bound = 1.0 / jnp.sqrt(fan_in)
        w = jax.random.uniform(kw, (fan_in, fan_out), jnp.float32, -bound, bound)
        b = jax.random.uniform(kb, (1, fan_out), jnp.float32, -bound, bound)
        return w, b

    w1, b1 = lin(ks[0], ks[1], obs_dim, hidden)
    w2, b2 = lin(ks[2], ks[3], hidden, hidden)
    wm, bm = lin(ks[4], ks[5], hidden, act_dim)
    wl, bl = lin(ks[6], ks[7], hidden, act_dim)
    return dict(w1=w1, b1=b1, w2=w2, b2=b2, wm=wm, bm=bm, wl=wl, bl=bl)


def actor_forward_ref_f32(x, p):
    # Pure-f32 reference of the original module semantics.
    h = jnp.maximum(x @ p["w1"] + p["b1"], 0.0)
    h = jnp.maximum(h @ p["w2"] + p["b2"], 0.0)
    mean = h @ p["wm"] + p["bm"]
    log_std = jnp.tanh(h @ p["wl"] + p["bl"])
    log_std = LOG_STD_MIN + 0.5 * (LOG_STD_MAX - LOG_STD_MIN) * (log_std + 1.0)
    return mean, log_std


def actor_forward_ref_bf16(x, prepped):
    # Reference with the kernel's numerics (bf16 weights/activations, f32 acc).
    bf = jnp.bfloat16
    act_dim = prepped["act_dim"]
    act_pad = prepped["act_pad"]
    h = jnp.dot(x.astype(bf), prepped["w1"],
                preferred_element_type=jnp.float32) + prepped["b1"]
    h = jnp.maximum(h, 0.0).astype(bf)
    h = jnp.dot(h, prepped["w2"],
                preferred_element_type=jnp.float32) + prepped["b2"]
    h = jnp.maximum(h, 0.0).astype(bf)
    y = jnp.dot(h, prepped["wh"],
                preferred_element_type=jnp.float32) + prepped["bh"]
    mean = y[:, :act_dim]
    log_std = _LOGSTD_OFFSET + _LOGSTD_SCALE * jnp.tanh(y[:, act_pad:act_pad + act_dim])
    return mean, log_std


if __name__ == "__main__":
    key = jax.random.PRNGKey(0)
    k_x, k_p = jax.random.split(key)

    # batch not a multiple of the tile -> exercises the masked partial last block
    batch, obs_dim, act_dim = 12, 16, 8
    x = jax.random.normal(k_x, (batch, obs_dim), dtype=jnp.float32)
    params = init_params(k_p, obs_dim, act_dim)
    prepped = prepare_actor_params(params)

    mean, log_std = actor_forward(x, prepped)
    jax.block_until_ready((mean, log_std))

    # Exact-numerics check (same bf16-weight/activation, f32-accumulation path).
    mean_ref, logstd_ref = actor_forward_ref_bf16(x, prepped)
    assert jnp.allclose(mean, mean_ref, atol=1e-3, rtol=1e-3)
    assert jnp.allclose(log_std, logstd_ref, atol=1e-3, rtol=1e-3)

    # Loose check against the original full-f32 module semantics
    # (bf16 quantization of weights/activations is the only intentional delta).
    mean_f32, logstd_f32 = actor_forward_ref_f32(x, params)
    assert jnp.allclose(mean, mean_f32, atol=5e-2, rtol=5e-2)
    assert jnp.allclose(log_std, logstd_f32, atol=5e-2, rtol=5e-2)

    print("KERNEL_OK")
</pallas_src>

<mosaic_0001>
module attributes {stable_mosaic.version = 11 : i64} {
  func.func @actor_kernel(%arg0: i32, %arg1: memref<8x16xf32, #tpu.memory_space<vmem>>, %arg2: memref<16x256xbf16, #tpu.memory_space<vmem>>, %arg3: memref<1x256xf32, #tpu.memory_space<vmem>>, %arg4: memref<256x256xbf16, #tpu.memory_space<vmem>>, %arg5: memref<1x256xf32, #tpu.memory_space<vmem>>, %arg6: memref<256x256xbf16, #tpu.memory_space<vmem>>, %arg7: memref<1x256xf32, #tpu.memory_space<vmem>>, %arg8: memref<8x256xf32, #tpu.memory_space<vmem>>) attributes {dimension_semantics = [#tpu.dimension_semantics<parallel>], iteration_bounds = array<i64: 2>, scalar_prefetch = 0 : i64, scratch_operands = 0 : i64, tpu.core_type = #tpu.core_type<tc>, window_params = [{transform_indices = @transform_0, window_bounds = array<i64: 8, 16>}, {pipeline_mode = #tpu.pipeline_mode<synchronous>, transform_indices = @transform_1, window_bounds = array<i64: 16, 256>}, {pipeline_mode = #tpu.pipeline_mode<synchronous>, transform_indices = @transform_2, window_bounds = array<i64: 1, 256>}, {pipeline_mode = #tpu.pipeline_mode<synchronous>, transform_indices = @transform_3, window_bounds = array<i64: 256, 256>}, {pipeline_mode = #tpu.pipeline_mode<synchronous>, transform_indices = @transform_4, window_bounds = array<i64: 1, 256>}, {pipeline_mode = #tpu.pipeline_mode<synchronous>, transform_indices = @transform_5, window_bounds = array<i64: 256, 256>}, {pipeline_mode = #tpu.pipeline_mode<synchronous>, transform_indices = @transform_6, window_bounds = array<i64: 1, 256>}, {transform_indices = @transform_7, window_bounds = array<i64: 8, 256>}]} {
    %c0 = arith.constant 0 : index
    %c0_0 = arith.constant 0 : index
    %0 = vector.load %arg1[%c0, %c0_0] : memref<8x16xf32, #tpu.memory_space<vmem>>, vector<8x16xf32>
    %1 = arith.truncf %0 : vector<8x16xf32> to vector<8x16xbf16>
    %c0_1 = arith.constant 0 : index
    %c0_2 = arith.constant 0 : index
    %2 = vector.load %arg2[%c0_1, %c0_2] : memref<16x256xbf16, #tpu.memory_space<vmem>>, vector<16x256xbf16>
    %cst = arith.constant dense<0.000000e+00> : vector<8x256xf32>
    %3 = tpu.matmul %1, %2, %cst {dimension_numbers = #tpu.dot_dimension_numbers<[1], [0], [0], [1], [0, 0, 1, 1], [], []>} : vector<8x16xbf16>, vector<16x256xbf16>, vector<8x256xf32> -> vector<8x256xf32>
    %c0_3 = arith.constant 0 : index
    %c0_4 = arith.constant 0 : index
    %4 = vector.load %arg3[%c0_3, %c0_4] : memref<1x256xf32, #tpu.memory_space<vmem>>, vector<1x256xf32>
    %5 = vector.broadcast %4 : vector<1x256xf32> to vector<8x256xf32>
    %6 = arith.addf %3, %5 : vector<8x256xf32>
    %cst_5 = arith.constant 0.000000e+00 : f32
    %7 = vector.broadcast %cst_5 : f32 to vector<8x256xf32>
    %8 = arith.maximumf %6, %7 : vector<8x256xf32>
    %9 = arith.truncf %8 : vector<8x256xf32> to vector<8x256xbf16>
    %c0_6 = arith.constant 0 : index
    %c0_7 = arith.constant 0 : index
    %10 = vector.load %arg4[%c0_6, %c0_7] : memref<256x256xbf16, #tpu.memory_space<vmem>>, vector<256x256xbf16>
    %cst_8 = arith.constant dense<0.000000e+00> : vector<8x256xf32>
    %11 = tpu.matmul %9, %10, %cst_8 {dimension_numbers = #tpu.dot_dimension_numbers<[1], [0], [0], [1], [0, 0, 1, 1], [], []>} : vector<8x256xbf16>, vector<256x256xbf16>, vector<8x256xf32> -> vector<8x256xf32>
    %c0_9 = arith.constant 0 : index
    %c0_10 = arith.constant 0 : index
    %12 = vector.load %arg5[%c0_9, %c0_10] : memref<1x256xf32, #tpu.memory_space<vmem>>, vector<1x256xf32>
    %13 = vector.broadcast %12 : vector<1x256xf32> to vector<8x256xf32>
    %14 = arith.addf %11, %13 : vector<8x256xf32>
    %cst_11 = arith.constant 0.000000e+00 : f32
    %15 = vector.broadcast %cst_11 : f32 to vector<8x256xf32>
    %16 = arith.maximumf %14, %15 : vector<8x256xf32>
    %17 = arith.truncf %16 : vector<8x256xf32> to vector<8x256xbf16>
    %c0_12 = arith.constant 0 : index
    %c0_13 = arith.constant 0 : index
    %18 = vector.load %arg6[%c0_12, %c0_13] : memref<256x256xbf16, #tpu.memory_space<vmem>>, vector<256x256xbf16>
    %cst_14 = arith.constant dense<0.000000e+00> : vector<8x256xf32>
    %19 = tpu.matmul %17, %18, %cst_14 {dimension_numbers = #tpu.dot_dimension_numbers<[1], [0], [0], [1], [0, 0, 1, 1], [], []>} : vector<8x256xbf16>, vector<256x256xbf16>, vector<8x256xf32> -> vector<8x256xf32>
    %c0_15 = arith.constant 0 : index
    %c0_16 = arith.constant 0 : index
    %20 = vector.load %arg7[%c0_15, %c0_16] : memref<1x256xf32, #tpu.memory_space<vmem>>, vector<1x256xf32>
    %21 = vector.broadcast %20 : vector<1x256xf32> to vector<8x256xf32>
    %22 = arith.addf %19, %21 : vector<8x256xf32>
    %23 = vector.extract_strided_slice %22 {offsets = [0, 0], sizes = [8, 128], strides = [1, 1]} : vector<8x256xf32> to vector<8x128xf32>
    %24 = vector.extract_strided_slice %22 {offsets = [0, 128], sizes = [8, 128], strides = [1, 1]} : vector<8x256xf32> to vector<8x128xf32>
    %25 = math.tanh %24 : vector<8x128xf32>
    %cst_17 = arith.constant 3.500000e+00 : f32
    %26 = vector.broadcast %cst_17 : f32 to vector<8x128xf32>
    %27 = arith.mulf %26, %25 : vector<8x128xf32>
    %cst_18 = arith.constant -1.500000e+00 : f32
    %28 = vector.broadcast %cst_18 : f32 to vector<8x128xf32>
    %29 = arith.addf %28, %27 : vector<8x128xf32>
    %c0_19 = arith.constant 0 : index
    %c0_20 = arith.constant 0 : index
    %30 = vector.load %arg8[%c0_19, %c0_20] : memref<8x256xf32, #tpu.memory_space<vmem>>, vector<8x128xf32>
    tpu.vector_store %arg8[%c0_19, %c0_20], %23 {strides = array<i32>} : memref<8x256xf32, #tpu.memory_space<vmem>>, vector<8x128xf32>,
    %c0_21 = arith.constant 0 : index
    %c128 = arith.constant 128 : index
    %31 = vector.load %arg8[%c0_21, %c128] : memref<8x256xf32, #tpu.memory_space<vmem>>, vector<8x128xf32>
    tpu.vector_store %arg8[%c0_21, %c128], %29 {strides = array<i32>} : memref<8x256xf32, #tpu.memory_space<vmem>>, vector<8x128xf32>,
    return
  }
  func.func @transform_0(%arg0: i32) -> (i32, i32) {
    %c0_i32 = arith.constant 0 : i32
    %c0_i32_0 = arith.constant 0 : i32
    return %arg0, %c0_i32 : i32, i32
  }
  func.func @transform_1(%arg0: i32) -> (i32, i32) {
    %c0_i32 = arith.constant 0 : i32
    %c0_i32_0 = arith.constant 0 : i32
    %c0_i32_1 = arith.constant 0 : i32
    return %c0_i32, %c0_i32_0 : i32, i32
  }
  func.func @transform_2(%arg0: i32) -> (i32, i32) {
    %c0_i32 = arith.constant 0 : i32
    %c0_i32_0 = arith.constant 0 : i32
    %c0_i32_1 = arith.constant 0 : i32
    return %c0_i32, %c0_i32_0 : i32, i32
  }
  func.func @transform_3(%arg0: i32) -> (i32, i32) {
    %c0_i32 = arith.constant 0 : i32
    %c0_i32_0 = arith.constant 0 : i32
    %c0_i32_1 = arith.constant 0 : i32
    return %c0_i32, %c0_i32_0 : i32, i32
  }
  func.func @transform_4(%arg0: i32) -> (i32, i32) {
    %c0_i32 = arith.constant 0 : i32
    %c0_i32_0 = arith.constant 0 : i32
    %c0_i32_1 = arith.constant 0 : i32
    return %c0_i32, %c0_i32_0 : i32, i32
  }
  func.func @transform_5(%arg0: i32) -> (i32, i32) {
    %c0_i32 = arith.constant 0 : i32
    %c0_i32_0 = arith.constant 0 : i32
    %c0_i32_1 = arith.constant 0 : i32
    return %c0_i32, %c0_i32_0 : i32, i32
  }
  func.func @transform_6(%arg0: i32) -> (i32, i32) {
    %c0_i32 = arith.constant 0 : i32
    %c0_i32_0 = arith.constant 0 : i32
    %c0_i32_1 = arith.constant 0 : i32
    return %c0_i32, %c0_i32_0 : i32, i32
  }
  func.func @transform_7(%arg0: i32) -> (i32, i32) {
    %c0_i32 = arith.constant 0 : i32
    %c0_i32_0 = arith.constant 0 : i32
    return %arg0, %c0_i32 : i32, i32
  }
}

</mosaic_0001>

<bundles_post_ra>
// kernel: tpu_custom_call.1
= control target key start
LH: loop header
LB: loop body
LE: loop exit
PB: predicated region body
PF: predicated region fallthrough
CT: control target
= control target key end

     0   :  { %s1942_s0 = inlined_call_operand.hbm [shape: f32[12,16], index: 0, kind: input, shape index: {}]   ;;  %s1943_s1 = inlined_call_operand.hbm [shape: bf16[16,256], index: 1, kind: input, shape index: {}]   ;;  %s1944_s2 = inlined_call_operand.hbm [shape: f32[1,256], index: 2, kind: input, shape index: {}]   ;;  %s1945_s3 = inlined_call_operand.hbm [shape: bf16[256,256], index: 3, kind: input, shape index: {}]   ;;  %s1946_s4 = inlined_call_operand.vmem [shape: f32[1,256], index: 4, kind: input, shape index: {}]   ;;  %s1947_s5 = inlined_call_operand.hbm [shape: bf16[256,256], index: 5, kind: input, shape index: {}]   ;;  %s1948_s6 = inlined_call_operand.vmem [shape: f32[1,256], index: 6, kind: input, shape index: {}]   ;;  %s1949_s7 = inlined_call_operand.hbm [shape: f32[12,256], index: 7, kind: output, shape index: {}]  }
   0x1   :  { %1950 = sst [smem:[#allocation16_spill]] %s1943_s1 }
   0x2   :  { %1951 = sst [smem:[#allocation17_spill]] %s1944_s2 }
   0x3   :  { %12 = vsyncpa [#allocation3], 0 }
   0x4   :  { %14 = vsyncpa [#allocation3 + $0x1], 0 }
   0x5   :  { %15 = vsyncpa [#allocation6], 0 }
   0x6   :  { %16 = vsyncpa [#allocation9], 0 }
   0x7   :  { %17 = vsyncpa [#allocation4], 0 }
   0x8   :  { %19 = vsyncpa [#allocation4 + $0x1], 0  ;;  %s1766_s24 = smov 0   ;;  %s1768_s25 = smov 0  }
   0x9   :  { %s1770_s26 = smov 0   ;;  %s1772_s27 = smov 0  }
   0xa LB: > { %s1952_s1 = sld [smem:[#allocation16_spill]]  ;;  %s1790_s8 = sadd.s32 4294967295, %s1718_s27   ;;  %s1718_s27 = sphi %s1772_s27, %s1965_s27   ;;  %s1714_s26 = sphi %s1770_s26, %s1964_s26   ;;  %s1710_s25 = sphi %s1768_s25, %s1963_s25   ;;  %s1706_s24 = sphi %s1766_s24, %s1962_s24  }
   0xb   : > { %p1050_p0 = scmp.ge.s32.totalorder %s1718_s27, 1  ;;  %p46_p1 = scmp.eq.s32.totalorder %s1790_s8, 0 }
   0xc   : > { %p208_p2 = scmp.lt.s32.totalorder %s1718_s27, 3  ;;  %s1720_s10 = smov [#allocation5]  }
   0xd   : > { %s221_s11 = sshll.u32 %s1720_s10, 4  ;;  %s245_s14 = sshll.u32 %s1945_s3, 4  ;;  %s222_s11 = int_to_ptr.vmem [resolvable:$true] %s221_s11  ;;  %s246_s14 = int_to_ptr.hbm [resolvable:$true] %s245_s14 }
   0xe   : > { %p1795_p3 = pnand %p1050_p0, %p208_p2  ;;  %s1955_s2 = sld [smem:[#allocation17_spill]] }
   0xf   : > { %s1721_s19 = smov [#allocation8]   ;;  %s1722_s21 = smov 128  }
  0x10   : > { %s219_s30 = sshll.u32 %s1952_s1, 4  ;;  %p1423_p4 = pneg %p1795_p3  ;;  %s220_s30 = int_to_ptr.hbm [resolvable:$true] %s219_s30 }
  0x11   : > { %s247_s20 = sshll.u32 %s1721_s19, 4  ;;  %s1723_s22 = smov 8   ;;  %s248_s20 = int_to_ptr.vmem [resolvable:$true] %s247_s20 }
  0x12   : > { %p1807_p6 = pnand %p1423_p4, %p46_p1  ;;  %s262_s29 = sshll.u32 %s1947_s5, 4  ;;  %s263_s29 = int_to_ptr.hbm [resolvable:$true] %s262_s29 }
  0x13   : > { %s1724_s10 = smov [#allocation7]   ;;  %s1049_s13 = sadd.s32 4294967294, %s1718_s27  }
  0x14   : > { %s234_s18 = sshll.u32 %s1955_s2, 4  ;;  %s236_s12 = sshll.u32 %s1724_s10, 4  ;;  %s235_s18 = int_to_ptr.hbm [resolvable:$true] %s234_s18  ;;  %s237_s12 = int_to_ptr.vmem [resolvable:$true] %s236_s12 }
  0x15   : > { %1426 = dma.hbm_to_vmem [thread:$0]  (!%p1807_p6), %s220_s30, 256, %s222_s11, [#allocation6], %s1722_s21, %s1722_s21, %s1723_s22  }
  0x16   : > { %1432 = dma.hbm_to_vmem [thread:$0]  (!%p1807_p6), %s246_s14, 4096, %s248_s20, [#allocation9], %s1722_s21, %s1722_s21, %s1723_s22  }
  0x17   : > { %1429 = dma.hbm_to_vmem [thread:$0]  (!%p1807_p6), %s235_s18, 32, %s237_s12, [#allocation6]  }
  0x18   : > { %s1725_s30 = smov [#allocation10]   ;;  %s1827_s14 = sadd.s32 1, %s1718_s27  }
  0x19   : > { %s264_s11 = sshll.u32 %s1725_s30, 4  ;;  %s29_s16 = ssub.s32 %s1718_s27, %s1827_s14  ;;  %s265_s11 = int_to_ptr.vmem [resolvable:$true] %s264_s11 }
  0x1a   : > { %1435 = dma.hbm_to_vmem [thread:$0]  (!%p1807_p6), %s263_s29, 4096, %s265_s11, [#allocation9], %s1722_s21, %s1722_s21, %s1723_s22  }
  0x1b   : > { %s32_s17 = sadd.s32 1, %s1714_s26  ;;  %p30_p7 = scmp.eq.s32.totalorder %s29_s16, 0 }
  0x1c   : > { %p39_p8 = scmp.ne.s32.totalorder %s1714_s26, %s1710_s25  ;;  %p40_p9 = scmp.eq.s32.totalorder %s1718_s27, 0 }
  0x1d   : > { %p45_p10 = scmp.ne.s32.totalorder %s1710_s25, %s1706_s24  ;;  %p195_p13 = scmp.eq.s32.totalorder %s1790_s8, 1 }
  0x1e   : > { %s1838_s18 = scalar_select %p30_p7, %s1714_s26, %s32_s17  }
  0x1f   : > { %p1840_p11 = por %p40_p9, %p39_p8  ;;  %p1846_p12 = por %p46_p1, %p45_p10 }
  0x20   : > { %p201_p0 = scmp.eq.s32.totalorder %s1049_s13, 1  ;;  %p1448_p2 = scmp.lt.s32.totalorder %s1718_s27, 2 }
  0x21   : > { %s281_s20 = sand.u32 1, %s1714_s26   ;;  %p1853_p4 = por %p195_p13, %p39_p8 }
  0x22   : > { %p1857_p6 = por %p201_p0, %p45_p10  ;;  %s1056_s23 = sshll.u32 %s281_s20, 3 }
  0x23   : > { %s1057_s28 = sshll.u32 %s1718_s27, 3  ;;  %s285_s30 = scalar_lea.vmem [#allocation2], %s1056_s23 }
  0x24   : > { %s289_s12 = scalar_lea.hbm %s1942_s0, %s1057_s28  ;;  %s293_s11 = sshll.u32 %s285_s30, 4  ;;  %s294_s11 = int_to_ptr.vmem [resolvable:$true] %s293_s11 }
  0x25   : > { %s291_s16 = sshll.u32 %s289_s12, 4  ;;  %p1867_p7 = pnand %p1448_p2, %p1840_p11  ;;  %s292_s16 = int_to_ptr.hbm [resolvable:$true] %s291_s16 }
  0x26   : > { %s282_s17 = scalar_lea.sflag [#allocation3], %s281_s20  ;;  %s1614_s1 = sshra.s32 %s292_s16, 4  ;;  %s1615_s1 = int_to_ptr.hbm [resolvable:$true] %s1614_s1 }
  0x27   : > { %s1616_s2 = scalar_lea.hbm %s1615_s1, 8  ;;  %p1618_p9 = pneg %p1867_p7 }
  0x28   : > { %p1617_p8 = scmp.ne.s32.totalorder %s1615_s1, %s1616_s2  ;;  %s1621_s29 = scalar_lea.hbm %s1942_s0, 16 }
  0x29   : > { %p1622_p11 = scmp.lt.s32.totalorder %s1615_s1, %s1942_s0  ;;  %p1623_p0 = scmp.lt.s32.totalorder %s1621_s29, %s1616_s2 }
  0x2a   : > { %p1619_p10 = pnand %p1618_p9, %p1617_p8 }
  0x2b   : > { %p1624_p2 = por %p1623_p0, %p1622_p11 }
  0x2c   : > { %p1620_p13 = pneg %p1619_p10 }
  0x2e   : > { %p1625_p5 = pnand %p1624_p2, %p1620_p13 }
  0x30   : > { %1628 = shalt.err (!%p1625_p5)
}
  0x31   : > { %1439 = dma.hbm_to_vmem [thread:$0]  (!%p1867_p7), %s292_s16, 128, %s294_s11, %s282_s17  }
  0x32   : > { %302 = sbr.rel (%p1795_p3) target bundleno = 482 (0x1e2), region = 48  ;;  %s1884_s20 = sand.u32 (!%p1795_p3), 1, %s1710_s25  }
  0x33   : > { %s1059_s12 = sshll.u32 (!%p1795_p3), %s1884_s20, 3  ;;  %s305_s30 = scalar_lea.sflag (!%p1795_p3), [#allocation3], %s1884_s20 }
  0x34   : > { %s308_s23 = scalar_lea.vmem (!%p1795_p3), [#allocation2], %s1059_s12 }
  0x37   : > { %1689 = dma.done.wait (%p1846_p12), %s305_s30, 128  }
  0x38   : > { %1691 = vsyncadd (%p1846_p12), %s305_s30, 4294967168 }
  0x39   : > { %1693 = dma.done.wait (%p46_p1), [#allocation6], 288  }
  0x3a   : > { %1695 = vsyncadd (%p46_p1), [#allocation6], 4294967008 }
  0x3b   : > { %1697 = dma.done.wait (%p46_p1), [#allocation9], 8192  }
  0x3c   : > { %1699 = vsyncadd (%p46_p1), [#allocation9], 4294959104  ;;  %v1067_v0 = vld [vmem:[#allocation5] sm:$0xf]  ;;  %v1337_v1 = vld [vmem:[#allocation5 + $0x4] sm:$0xf0] }
  0x3d   : > { %v1336_v2 = vld [vmem:[#allocation5 + $0x4] sm:$0xf]  ;;  %v1068_v3 = vor.u32 %v1337_v1, %v1067_v0  ;;  %v1069_v4 = vld [vmem:[#allocation5 + $0x8] sm:$0xf0]  ;;  %v361_v5 = vld [vmem:[%s308_s23] sm:$0xff]  ;;  %vm381_vm0 = vcmask 130048  }
  0x3e   : > { %v1133_v6 = vld [vmem:[#allocation8 + $0x70] sm:$0xf]  ;;  %v1072_v7 = vor.u32 %v1336_v2, %v1069_v4  ;;  %v362_v8 = vpack.c.bf16 %v361_v5, %v361_v5  ;;  %v1353_v9 = vld [vmem:[#allocation8 + $0x74] sm:$0xf0]  ;;  %v1352_v14 = vld [vmem:[#allocation8 + $0x74] sm:$0xf] }
  0x3f   : > { %v1197_v10 = vld [vmem:[#allocation8 + $0xf0] sm:$0xf]  ;;  %v1369_v11 = vld [vmem:[#allocation8 + $0xf4] sm:$0xf0]  ;;  %392 = vmatpush.bf16.msra.mxu0 %v1068_v3  ;;  %v1134_v12 = vor.u32 %v1353_v9, %v1133_v6  ;;  %v1135_v15 = vld [vmem:[#allocation8 + $0x78] sm:$0xf0] }
  0x40   : > { %v1198_v13 = vor.u32 %v1369_v11, %v1197_v10  ;;  %v1368_v16 = vld [vmem:[#allocation8 + $0xf4] sm:$0xf]  ;;  %405 = vmatpush.bf16.msra.mxu1 %v1072_v7  ;;  %v1138_v17 = vor.u32 %v1352_v14, %v1135_v15  ;;  %v1199_v18 = vld [vmem:[#allocation8 + $0xf8] sm:$0xf0]  ;;  %v1125_v19 = vld [vmem:[#allocation8 + $0x60] sm:$0xf] }
  0x41   : > { %v1351_v20 = vld [vmem:[#allocation8 + $0x64] sm:$0xf0]  ;;  %613 = vmatpush.bf16.msra.mxu2 %v1134_v12  ;;  %v1202_v21 = vor.u32 %v1368_v16, %v1199_v18  ;;  %v1189_v23 = vld [vmem:[#allocation8 + $0xe0] sm:$0xf]  ;;  %v1350_v25 = vld [vmem:[#allocation8 + $0x64] sm:$0xf] }
  0x42   : > { %626 = vmatpush.bf16.msra.mxu3 %v1198_v13  ;;  %v1126_v22 = vor.u32 %v1351_v20, %v1125_v19  ;;  %v1367_v24 = vld [vmem:[#allocation8 + $0xe4] sm:$0xf0]  ;;  %1073 = vmatmul.msk.bf16.vlgmr.msra.gmra.mxu0 %vm381_vm0, %v362_v8  ;;  %v1127_v27 = vld [vmem:[#allocation8 + $0x68] sm:$0xf0]  ;;  %v1366_v28 = vld [vmem:[#allocation8 + $0xe4] sm:$0xf] }
  0x43   : > { %v1190_v26 = vor.u32 %v1367_v24, %v1189_v23  ;;  %v1191_v29 = vld [vmem:[#allocation8 + $0xe8] sm:$0xf0]  ;;  %1074 = vmatmul.msk.bf16.vlgmr.msra.gmra.mxu1 %vm381_vm0, %v362_v8  ;;  %639 = vmatpush.bf16.msrb.mxu0 %v1138_v17  ;;  %v1130_v30 = vor.u32 %v1350_v25, %v1127_v27  ;;  %v1117_v31 = vld [vmem:[#allocation8 + $0x50] sm:$0xf]  ;;  %v1349_v32 = vld [vmem:[#allocation8 + $0x54] sm:$0xf0] }
  0x44   : > { %v1181_v33 = vld [vmem:[#allocation8 + $0xd0] sm:$0xf]  ;;  %652 = vmatpush.bf16.msrb.mxu1 %v1202_v21  ;;  %v1194_v34 = vor.u32 %v1366_v28, %v1191_v29  ;;  %v1365_v35 = vld [vmem:[#allocation8 + $0xd4] sm:$0xf0]  ;;  %v1348_v36 = vld [vmem:[#allocation8 + $0x54] sm:$0xf]  ;;  %v1118_v38 = vor.u32 %v1349_v32, %v1117_v31 }
  0x45   : > { %v1119_v37 = vld [vmem:[#allocation8 + $0x58] sm:$0xf0]  ;;  %614 = vmatpush.bf16.msra.mxu2 %v1126_v22  ;;  %v1182_v39 = vor.u32 %v1365_v35, %v1181_v33  ;;  %v1364_v40 = vld [vmem:[#allocation8 + $0xd4] sm:$0xf]  ;;  %v1109_v42 = vld [vmem:[#allocation8 + $0x40] sm:$0xf] }
  0x46   : > { %627 = vmatpush.bf16.msra.mxu3 %v1190_v26  ;;  %v1183_v41 = vld [vmem:[#allocation8 + $0xd8] sm:$0xf0]  ;;  %v1347_v43 = vld [vmem:[#allocation8 + $0x44] sm:$0xf0]  ;;  %v1173_v44 = vld [vmem:[#allocation8 + $0xc0] sm:$0xf]  ;;  %v1122_v46 = vor.u32 %v1348_v36, %v1119_v37 }
  0x47   : > { %v1363_v45 = vld [vmem:[#allocation8 + $0xc4] sm:$0xf0]  ;;  %640 = vmatpush.bf16.msrb.mxu0 %v1130_v30  ;;  %v1186_v47 = vor.u32 %v1364_v40, %v1183_v41  ;;  %v1346_v48 = vld [vmem:[#allocation8 + $0x44] sm:$0xf]  ;;  %v1111_v49 = vld [vmem:[#allocation8 + $0x48] sm:$0xf0]  ;;  %v1110_v50 = vor.u32 %v1347_v43, %v1109_v42 }
  0x48   : > { %653 = vmatpush.bf16.msrb.mxu1 %v1194_v34  ;;  %v1174_v51 = vor.u32 %v1363_v45, %v1173_v44  ;;  %v1362_v52 = vld [vmem:[#allocation8 + $0xc4] sm:$0xf]  ;;  %v1175_v53 = vld [vmem:[#allocation8 + $0xc8] sm:$0xf0]  ;;  %v1101_v54 = vld [vmem:[#allocation8 + $0x30] sm:$0xf]  ;;  %v1114_v58 = vor.u32 %v1346_v48, %v1111_v49 }
  0x49   : > { %615 = vmatpush.bf16.msra.mxu2 %v1118_v38  ;;  %v1345_v55 = vld [vmem:[#allocation8 + $0x34] sm:$0xf0]  ;;  %v1165_v56 = vld [vmem:[#allocation8 + $0xb0] sm:$0xf]  ;;  %v1178_v59 = vor.u32 %v1362_v52, %v1175_v53  ;;  %v1344_v60 = vld [vmem:[#allocation8 + $0x34] sm:$0xf] }
  0x4a   : > { %628 = vmatpush.bf16.msra.mxu3 %v1182_v39  ;;  %v1361_v57 = vld [vmem:[#allocation8 + $0xb4] sm:$0xf0]  ;;  %v1103_v61 = vld [vmem:[#allocation8 + $0x38] sm:$0xf0]  ;;  %v1102_v62 = vor.u32 %v1345_v55, %v1101_v54  ;;  %v1360_v0 = vld [vmem:[#allocation8 + $0xb4] sm:$0xf] }
  0x4b   : > { %641 = vmatpush.bf16.msrb.mxu0 %v1122_v46  ;;  %v1166_v63 = vor.u32 %v1361_v57, %v1165_v56  ;;  %v1167_v1 = vld [vmem:[#allocation8 + $0xb8] sm:$0xf0]  ;;  %v1093_v2 = vld [vmem:[#allocation8 + $0x20] sm:$0xf]  ;;  %v1343_v3 = vld [vmem:[#allocation8 + $0x24] sm:$0xf0]  ;;  %v1106_v6 = vor.u32 %v1344_v60, %v1103_v61 }
  0x4c   : > { %654 = vmatpush.bf16.msrb.mxu1 %v1186_v47  ;;  %v1157_v4 = vld [vmem:[#allocation8 + $0xa0] sm:$0xf]  ;;  %v1359_v5 = vld [vmem:[#allocation8 + $0xa4] sm:$0xf0]  ;;  %v1170_v7 = vor.u32 %v1360_v0, %v1167_v1  ;;  %v1342_v8 = vld [vmem:[#allocation8 + $0x24] sm:$0xf]  ;;  %v1094_v10 = vor.u32 %v1343_v3, %v1093_v2 }
  0x4d   : > { %616 = vmatpush.bf16.msra.mxu2 %v1110_v50  ;;  %v1095_v9 = vld [vmem:[#allocation8 + $0x28] sm:$0xf0]  ;;  %v1158_v11 = vor.u32 %v1359_v5, %v1157_v4  ;;  %v1358_v12 = vld [vmem:[#allocation8 + $0xa4] sm:$0xf]  ;;  %v1085_v16 = vld [vmem:[#allocation8 + $0x10] sm:$0xf] }
  0x4e   : > { %629 = vmatpush.bf16.msra.mxu3 %v1174_v51  ;;  %v1159_v13 = vld [vmem:[#allocation8 + $0xa8] sm:$0xf0]  ;;  %v1098_v14 = vor.u32 %v1342_v8, %v1095_v9  ;;  %v1341_v17 = vld [vmem:[#allocation8 + $0x14] sm:$0xf0]  ;;  %v1149_v18 = vld [vmem:[#allocation8 + $0x90] sm:$0xf] }
  0x4f   : > { %642 = vmatpush.bf16.msrb.mxu0 %v1114_v58  ;;  %v1162_v15 = vor.u32 %v1358_v12, %v1159_v13  ;;  %v1086_v19 = vor.u32 %v1341_v17, %v1085_v16  ;;  %v1357_v20 = vld [vmem:[#allocation8 + $0x94] sm:$0xf0]  ;;  %v1340_v21 = vld [vmem:[#allocation8 + $0x14] sm:$0xf]  ;;  %v1087_v22 = vld [vmem:[#allocation8 + $0x18] sm:$0xf0] }
  0x50   : > { %655 = vmatpush.bf16.msrb.mxu1 %v1178_v59  ;;  %v1150_v23 = vor.u32 %v1357_v20, %v1149_v18  ;;  %v1090_v24 = vor.u32 %v1340_v21, %v1087_v22  ;;  %v1356_v25 = vld [vmem:[#allocation8 + $0x94] sm:$0xf]  ;;  %v1151_v26 = vld [vmem:[#allocation8 + $0x98] sm:$0xf0]  ;;  %v1077_v28 = vld [vmem:[#allocation8] sm:$0xf] }
  0x51   : > { %617 = vmatpush.bf16.msra.mxu2 %v1102_v62  ;;  %v1154_v27 = vor.u32 %v1356_v25, %v1151_v26  ;;  %v1339_v29 = vld [vmem:[#allocation8 + $0x4] sm:$0xf0]  ;;  %v1141_v30 = vld [vmem:[#allocation8 + $0x80] sm:$0xf]  ;;  %v1338_v33 = vld [vmem:[#allocation8 + $0x4] sm:$0xf] }
  0x52   : > { %630 = vmatpush.bf16.msra.mxu3 %v1166_v63  ;;  %v1078_v31 = vor.u32 %v1339_v29, %v1077_v28  ;;  %v1355_v32 = vld [vmem:[#allocation8 + $0x84] sm:$0xf0]  ;;  %v1079_v34 = vld [vmem:[#allocation8 + $0x8] sm:$0xf0]  ;;  %v1354_v37 = vld [vmem:[#allocation8 + $0x84] sm:$0xf] }
  0x53   : > { %643 = vmatpush.bf16.msrb.mxu0 %v1106_v6  ;;  %v1142_v35 = vor.u32 %v1355_v32, %v1141_v30  ;;  %v1082_v36 = vor.u32 %v1338_v33, %v1079_v34  ;;  %v1143_v38 = vld [vmem:[#allocation8 + $0x88] sm:$0xf0]  ;;  %v1325_v40 = vld [vmem:[#allocation10 + $0xf0] sm:$0xf]  ;;  %v1401_v41 = vld [vmem:[#allocation10 + $0xf4] sm:$0xf0] }
  0x54   : > { %656 = vmatpush.bf16.msrb.mxu1 %v1170_v7  ;;  %v1146_v39 = vor.u32 %v1354_v37, %v1143_v38  ;;  %v1400_v42 = vld [vmem:[#allocation10 + $0xf4] sm:$0xf]  ;;  %v1326_v43 = vor.u32 %v1401_v41, %v1325_v40  ;;  %v1327_v44 = vld [vmem:[#allocation10 + $0xf8] sm:$0xf0]  ;;  %v1317_v45 = vld [vmem:[#allocation10 + $0xe0] sm:$0xf] }
  0x55   : > { %618 = vmatpush.bf16.msra.mxu2 %v1094_v10  ;;  %v1399_v46 = vld [vmem:[#allocation10 + $0xe4] sm:$0xf0]  ;;  %v1330_v47 = vor.u32 %v1400_v42, %v1327_v44  ;;  %v1398_v48 = vld [vmem:[#allocation10 + $0xe4] sm:$0xf]  ;;  %v1319_v49 = vld [vmem:[#allocation10 + $0xe8] sm:$0xf0] }
  0x56   : > { %631 = vmatpush.bf16.msra.mxu3 %v1158_v11  ;;  %v1261_v50 = vld [vmem:[#allocation10 + $0x70] sm:$0xf]  ;;  %v1318_v51 = vor.u32 %v1399_v46, %v1317_v45  ;;  %v1385_v52 = vld [vmem:[#allocation10 + $0x74] sm:$0xf0]  ;;  %v1384_v53 = vld [vmem:[#allocation10 + $0x74] sm:$0xf]  ;;  %v1322_v55 = vor.u32 %v1398_v48, %v1319_v49 }
  0x57   : > { %644 = vmatpush.bf16.msrb.mxu0 %v1098_v14  ;;  %v1263_v54 = vld [vmem:[#allocation10 + $0x78] sm:$0xf0]  ;;  %v1262_v56 = vor.u32 %v1385_v52, %v1261_v50  ;;  %v1309_v58 = vld [vmem:[#allocation10 + $0xd0] sm:$0xf]  ;;  %v1397_v59 = vld [vmem:[#allocation10 + $0xd4] sm:$0xf0] }
  0x58   : > { %657 = vmatpush.bf16.msrb.mxu1 %v1162_v15  ;;  %v1266_v57 = vor.u32 %v1384_v53, %v1263_v54  ;;  %v1396_v60 = vld [vmem:[#allocation10 + $0xd4] sm:$0xf]  ;;  %v1311_v61 = vld [vmem:[#allocation10 + $0xd8] sm:$0xf0]  ;;  %v1253_v62 = vld [vmem:[#allocation10 + $0x60] sm:$0xf]  ;;  %v1310_v3 = vor.u32 %v1397_v59, %v1309_v58 }
  0x59   : > { %619 = vmatpush.bf16.msra.mxu2 %v1086_v19  ;;  %v1383_v63 = vld [vmem:[#allocation10 + $0x64] sm:$0xf0]  ;;  %v1382_v1 = vld [vmem:[#allocation10 + $0x64] sm:$0xf]  ;;  %v1255_v2 = vld [vmem:[#allocation10 + $0x68] sm:$0xf0]  ;;  %v1314_v7 = vor.u32 %v1396_v60, %v1311_v61 }
  0x5a   : > { %632 = vmatpush.bf16.msra.mxu3 %v1150_v23  ;;  %v1254_v0 = vor.u32 %v1383_v63, %v1253_v62  ;;  %v1258_v4 = vor.u32 %v1382_v1, %v1255_v2  ;;  %v1301_v5 = vld [vmem:[#allocation10 + $0xc0] sm:$0xf]  ;;  %v1395_v6 = vld [vmem:[#allocation10 + $0xc4] sm:$0xf0]  ;;  %v1245_v8 = vld [vmem:[#allocation10 + $0x50] sm:$0xf] }
  0x5b   : > { %645 = vmatpush.bf16.msrb.mxu0 %v1090_v24  ;;  %v1381_v9 = vld [vmem:[#allocation10 + $0x54] sm:$0xf0]  ;;  %v1380_v10 = vld [vmem:[#allocation10 + $0x54] sm:$0xf]  ;;  %v1394_v11 = vld [vmem:[#allocation10 + $0xc4] sm:$0xf]  ;;  %v1302_v17 = vor.u32 %v1395_v6, %v1301_v5 }
  0x5c   : > { %658 = vmatpush.bf16.msrb.mxu1 %v1154_v27  ;;  %v1303_v12 = vld [vmem:[#allocation10 + $0xc8] sm:$0xf0]  ;;  %v1247_v13 = vld [vmem:[#allocation10 + $0x58] sm:$0xf0]  ;;  %v1246_v14 = vor.u32 %v1381_v9, %v1245_v8  ;;  %v1237_v16 = vld [vmem:[#allocation10 + $0x40] sm:$0xf] }
  0x5d   : > { %620 = vmatpush.bf16.msra.mxu2 %v1078_v31  ;;  %v1250_v15 = vor.u32 %v1380_v10, %v1247_v13  ;;  %v1379_v18 = vld [vmem:[#allocation10 + $0x44] sm:$0xf0]  ;;  %v1378_v19 = vld [vmem:[#allocation10 + $0x44] sm:$0xf]  ;;  %v1239_v20 = vld [vmem:[#allocation10 + $0x48] sm:$0xf0]  ;;  %v1306_v21 = vor.u32 %v1394_v11, %v1303_v12 }
  0x5e   : > { %633 = vmatpush.bf16.msra.mxu3 %v1142_v35  ;;  %v1293_v22 = vld [vmem:[#allocation10 + $0xb0] sm:$0xf]  ;;  %v1393_v23 = vld [vmem:[#allocation10 + $0xb4] sm:$0xf0]  ;;  %v1392_v24 = vld [vmem:[#allocation10 + $0xb4] sm:$0xf]  ;;  %v1238_v26 = vor.u32 %v1379_v18, %v1237_v16  ;;  %v1242_v27 = vor.u32 %v1378_v19, %v1239_v20 }
  0x5f   : > { %646 = vmatpush.bf16.msrb.mxu0 %v1082_v36  ;;  %v1295_v25 = vld [vmem:[#allocation10 + $0xb8] sm:$0xf0]  ;;  %v1294_v28 = vor.u32 %v1393_v23, %v1293_v22  ;;  %v1285_v30 = vld [vmem:[#allocation10 + $0xa0] sm:$0xf]  ;;  %v1391_v31 = vld [vmem:[#allocation10 + $0xa4] sm:$0xf0] }
  0x60   : > { %659 = vmatpush.bf16.msrb.mxu1 %v1146_v39  ;;  %v1298_v29 = vor.u32 %v1392_v24, %v1295_v25  ;;  %v365_v32 = vld [vmem:[#allocation7] sm:$0x3]  ;;  %v1390_v33 = vld [vmem:[#allocation10 + $0xa4] sm:$0xf]  ;;  %v1287_v34 = vld [vmem:[#allocation10 + $0xa8] sm:$0xf0]  ;;  %v1286_v35 = vor.u32 %v1391_v31, %v1285_v30 }
  0x61   : > { %867 = vmatpush.bf16.msrb.mxu2 %v1262_v56  ;;  %v367_v36 = vperm.slane %v365_v32, 0  ;;  %v1290_v37 = vor.u32 %v1390_v33, %v1287_v34  ;;  %v368_v38 = vperm.slane %v365_v32, 1  ;;  %v1229_v49 = vld [vmem:[#allocation10 + $0x30] sm:$0xf]  ;;  %v1377_v50 = vld [vmem:[#allocation10 + $0x34] sm:$0xf0] }
  0x62   : > { %880 = vmatpush.bf16.msrb.mxu3 %v1326_v43  ;;  %v1230_v52 = vor.u32 %v1377_v50, %v1229_v49  ;;  %v1231_v53 = vld [vmem:[#allocation10 + $0x38] sm:$0xf0]  ;;  %v1389_v56 = vld [vmem:[#allocation10 + $0x94] sm:$0xf0]  ;;  %v1221_v61 = vld [vmem:[#allocation10 + $0x20] sm:$0xf] }
  0x63   : > { %893 = vmatpush.bf16.msra.mxu0 %v1266_v57  ;;  %v1388_v57 = vld [vmem:[#allocation10 + $0x94] sm:$0xf]  ;;  %v1279_v59 = vld [vmem:[#allocation10 + $0x98] sm:$0xf0]  ;;  %v1375_v62 = vld [vmem:[#allocation10 + $0x24] sm:$0xf0] }
  0x64   : > { %906 = vmatpush.bf16.msra.mxu1 %v1330_v47  ;;  %v1282_v60 = vor.u32 %v1388_v57, %v1279_v59  ;;  %v1374_v63 = vld [vmem:[#allocation10 + $0x24] sm:$0xf]  ;;  %v1223_v1 = vld [vmem:[#allocation10 + $0x28] sm:$0xf0]  ;;  %v1213_v9 = vld [vmem:[#allocation10 + $0x10] sm:$0xf] }
  0x65   : > { %868 = vmatpush.bf16.msrb.mxu2 %v1254_v0  ;;  %v1222_v0 = vor.u32 %v1375_v62, %v1221_v61  ;;  %v1226_v2 = vor.u32 %v1374_v63, %v1223_v1  ;;  %v1386_v5 = vld [vmem:[#allocation10 + $0x84] sm:$0xf]  ;;  %v1373_v10 = vld [vmem:[#allocation10 + $0x14] sm:$0xf0]  ;;  %v1372_v12 = vld [vmem:[#allocation10 + $0x14] sm:$0xf] }
  0x66   : > { %881 = vmatpush.bf16.msrb.mxu3 %v1318_v51  ;;  %v1376_v51 = vld [vmem:[#allocation10 + $0x34] sm:$0xf]  ;;  %v1214_v11 = vor.u32 %v1373_v10, %v1213_v9  ;;  %v1215_v13 = vld [vmem:[#allocation10 + $0x18] sm:$0xf0]  ;;  %v1371_v16 = vld [vmem:[#allocation10 + $0x4] sm:$0xf0] }
  0x67   : > { %894 = vmatpush.bf16.msra.mxu0 %v1258_v4  ;;  %v1234_v54 = vor.u32 %v1376_v51, %v1231_v53  ;;  %v1387_v4 = vld [vmem:[#allocation10 + $0x84] sm:$0xf0]  ;;  %v1207_v19 = vld [vmem:[#allocation10 + $0x8] sm:$0xf0]  ;;  %s1064_s11 = sshll.u32 %s1884_s20, 4  ;;  %s1402_s16 = sshll.u32 %s1790_s8, 4 }
  0x68   : > { %907 = vmatpush.bf16.msra.mxu1 %v1322_v55  ;;  %v1277_v55 = vld [vmem:[#allocation10 + $0x90] sm:$0xf]  ;;  %s936_s28 = scalar_lea.hbm %s1949_s7, %s1402_s16  ;;  %s359_s29 = scalar_lea.vmem [#allocation11], %s1064_s11 }
  0x69   : > { %869 = vmatpush.bf16.msrb.mxu2 %v1246_v14  ;;  %v1278_v58 = vor.u32 %v1389_v56, %v1277_v55  ;;  %v1218_v14 = vor.u32 %v1372_v12, %v1215_v13  ;;  %s938_s10 = sshll.u32 %s359_s29, 4  ;;  %s940_s19 = sshll.u32 %s936_s28, 4  ;;  %s939_s10 = int_to_ptr.vmem [resolvable:$true] %s938_s10  ;;  %s941_s19 = int_to_ptr.hbm [resolvable:$true] %s940_s19 }
  0x6a   : > { %882 = vmatpush.bf16.msrb.mxu3 %v1310_v3  ;;  %v1269_v3 = vld [vmem:[#allocation10 + $0x80] sm:$0xf]  ;;  %s925_s8 = scalar_lea.sflag [#allocation4], %s1884_s20  ;;  %s1658_s12 = sshra.s32 %s941_s19, 4  ;;  %s1659_s12 = int_to_ptr.hbm [resolvable:$true] %s1658_s12 }
  0x6b   : > { %895 = vmatpush.bf16.msra.mxu0 %v1250_v15  ;;  %v1270_v6 = vor.u32 %v1387_v4, %v1269_v3  ;;  %v1205_v15 = vld [vmem:[#allocation10] sm:$0xf]  ;;  %s1660_s30 = scalar_lea.hbm %s1659_s12, 16  ;;  %s1664_s2 = scalar_lea.hbm %s1949_s7, 32 }
  0x6c   : > { %908 = vmatpush.bf16.msra.mxu1 %v1314_v7  ;;  %v1271_v7 = vld [vmem:[#allocation10 + $0x88] sm:$0xf0]  ;;  %v1206_v18 = vor.u32 %v1371_v16, %v1205_v15  ;;  %p1661_p1 = scmp.ne.s32.totalorder %s1659_s12, %s1660_s30  ;;  %p1665_p12 = scmp.lt.s32.totalorder %s1659_s12, %s1949_s7 }
  0x6d   : > { %870 = vmatpush.bf16.msrb.mxu2 %v1238_v26  ;;  %v1274_v8 = vor.u32 %v1386_v5, %v1271_v7  ;;  %p1666_p7 = scmp.lt.s32.totalorder %s1664_s2, %s1660_s30 }
  0x6e   : > { %883 = vmatpush.bf16.msrb.mxu3 %v1302_v17  ;;  %v1370_v17 = vld [vmem:[#allocation10 + $0x4] sm:$0xf]  ;;  %p1662_p3 = pnand %p1661_p1, %p1853_p4 }
  0x6f   : > { %896 = vmatpush.bf16.msra.mxu0 %v1242_v27  ;;  %v1210_v20 = vor.u32 %v1370_v17, %v1207_v19  ;;  %p1667_p8 = por %p1666_p7, %p1665_p12 }
  0x70   : > { %909 = vmatpush.bf16.msra.mxu1 %v1306_v21  ;;  %v447_v21 = vld [vmem:[%s1946_s4] sm:$0x3]  ;;  %p1663_p5 = pneg %p1662_p3 }
  0x71   : > { %871 = vmatpush.bf16.msrb.mxu2 %v1230_v52  ;;  %v450_v22 = vperm.slane %v447_v21, 1  ;;  %v449_v27 = vperm.slane %v447_v21, 0 }
  0x72   : > { %884 = vmatpush.bf16.msrb.mxu3 %v1294_v28  ;;  %p1668_p9 = pnand %p1667_p8, %p1663_p5 }
  0x73   : > { %897 = vmatpush.bf16.msra.mxu0 %v1234_v54 }
  0x74   : > { %910 = vmatpush.bf16.msra.mxu1 %v1298_v29 }
  0x75   : > { %872 = vmatpush.bf16.msrb.mxu2 %v1222_v0 }
  0x76   : > { %885 = vmatpush.bf16.msrb.mxu3 %v1286_v35 }
  0x77   : > { %898 = vmatpush.bf16.msra.mxu0 %v1226_v2 }
  0x78   : > { %911 = vmatpush.bf16.msra.mxu1 %v1290_v37 }
  0x79   : > { %873 = vmatpush.bf16.msrb.mxu2 %v1214_v11 }
  0x7a   : > { %886 = vmatpush.bf16.msrb.mxu3 %v1278_v58 }
  0x7b   : > { %899 = vmatpush.bf16.msra.mxu0 %v1218_v14 }
  0x7c   : > { %912 = vmatpush.bf16.msra.mxu1 %v1282_v60 }
  0x7d   : > { %874 = vmatpush.bf16.msrb.mxu2 %v1206_v18 }
  0x7e   : > { %887 = vmatpush.bf16.msrb.mxu3 %v1270_v6 }
  0x7f   : > { %900 = vmatpush.bf16.msra.mxu0 %v1210_v20 }
  0x80   : > { %913 = vmatpush.bf16.msra.mxu1 %v1274_v8 }
  0xbf   : > { %v394_v39 = vpop.f32.mrf.mxu0 }
  0xc0   : > { %v395_v40 = vadd.f32 %v394_v39, %v367_v36  ;;  %v407_v41 = vpop.f32.mrf.mxu1 }
  0xc1   : > { %v408_v42 = vadd.f32 %v407_v41, %v368_v38  ;;  %v701_v41 = vld [vmem:[%s1948_s6] sm:$0x3] }
  0xc2   : > { %v411_v43 = vmax.f32 %v395_v40, 0.0 }
  0xc3   : > { %v412_v44 = vmax.f32 %v408_v42, 0.0  ;;  %v704_v42 = vperm.slane %v701_v41, 1 }
  0xc4   : > { %v413_v45 = vpack.c.bf16 %v411_v43, %v411_v43 }
  0xc5   : > { %v414_v46 = vpack.c.bf16 %v412_v44, %v412_v44 }
  0xc6   : > { %621 = vmatmul.bf16.vlgmr.msra.gmra.mxu2 %v413_v45  ;;  %647 = vmatmul.bf16.vlgmr.msrb.gmra.mxu0 %v413_v45 }
  0xc7   : > { %634 = vmatmul.bf16.vlgmr.msra.gmra.mxu3 %v414_v46  ;;  %660 = vmatmul.bf16.vlgmr.msrb.gmra.mxu1 %v414_v46  ;;  %v396_v47 = vpop.f32.mrf.mxu0 }
  0xc8   : > { %v409_v48 = vpop.f32.mrf.mxu1 }
  0xc9   : > { %v703_v48 = vperm.slane %v701_v41, 0 }
 0x143   : > { %v648_v23 = vpop.f32.mrf.mxu0 }
 0x144   : > { %v649_v24 = vadd.f32 %v648_v23, %v450_v22  ;;  %v661_v25 = vpop.f32.mrf.mxu1 }
 0x146   : > { %v662_v26 = vadd.f32 %v661_v25, %v649_v24 }
 0x148   : > { %v666_v28 = vmax.f32 %v662_v26, 0.0 }
 0x149   : > { %v622_v29 = vpop.f32.mrf.mxu2 }
 0x14a   : > { %v668_v30 = vpack.c.bf16 %v666_v28, %v666_v28  ;;  %v623_v31 = vadd.f32 %v622_v29, %v449_v27  ;;  %v635_v32 = vpop.f32.mrf.mxu3 }
 0x14b   : > { %v650_v33 = vpop.f32.mrf.mxu0 }
 0x14c   : > { %v636_v34 = vadd.f32 %v635_v32, %v623_v31  ;;  %v663_v35 = vpop.f32.mrf.mxu1  ;;  %888 = vmatmul.bf16.vlgmr.msrb.gmra.mxu3 %v668_v30  ;;  %914 = vmatmul.bf16.vlgmr.msra.gmra.mxu1 %v668_v30 }
 0x14e   : > { %v665_v36 = vmax.f32 %v636_v34, 0.0 }
 0x150   : > { %v667_v37 = vpack.c.bf16 %v665_v36, %v665_v36 }
 0x151   : > { %v624_v38 = vpop.f32.mrf.mxu2 }
 0x152   : > { %v637_v39 = vpop.f32.mrf.mxu3  ;;  %875 = vmatmul.bf16.vlgmr.msrb.gmra.mxu2 %v667_v37  ;;  %901 = vmatmul.bf16.vlgmr.msra.gmra.mxu0 %v667_v37 }
 0x1c9   : > { %v915_v40 = vpop.f32.mrf.mxu1 }
 0x1cf   : > { %v889_v43 = vpop.f32.mrf.mxu3  ;;  %v902_v44 = vpop.f32.mrf.mxu0 }
 0x1d0   : > { %v903_v45 = vadd.f32 %v902_v44, %v704_v42 }
 0x1d1   : > { %v917_v46 = vpop.f32.mrf.mxu1 }
 0x1d2   : > { %v916_v47 = vadd.f32 %v915_v40, %v903_v45 }
 0x1d4   : > { %1492 = vtanh.f32 %v916_v47 }
 0x1d5   : > { %v876_v49 = vpop.f32.mrf.mxu2 }
 0x1d6   : > { %v877_v50 = vadd.f32 %v876_v49, %v703_v48 }
 0x1d7   : > { %v891_v51 = vpop.f32.mrf.mxu3  ;;  %v904_v52 = vpop.f32.mrf.mxu0 }
 0x1d8   : > { %v890_v53 = vadd.f32 %v889_v43, %v877_v50 }
 0x1da   : > { %v1493_v54 = vpop.eup %1492  ;;  %922 = vst [vmem:[%s359_s29] sm:$0xff] %v890_v53 }
 0x1db   : > { %v920_v55 = vmul.f32 3.5, %v1493_v54 }
 0x1dd   : > { %v921_v56 = vadd.f32 -1.5, %v920_v55  ;;  %v878_v57 = vpop.f32.mrf.mxu2 }
 0x1df   : > { %923 = vst [vmem:[%s359_s29 + $0x8] sm:$0xff] %v921_v56 }
 0x1e0   : > { %1671 = shalt.err (!%p1668_p9)
}
 0x1e1   : > { %1421 = dma.vmem_to_hbm [thread:$0]  (%p1853_p4), %s939_s10, 256, %s941_s19, %s925_s8  }
 0x1e2 PF: > { %s952_s20 = sand.u32 1, %s1706_s24   ;;  %p1961_p10 = scmp.ge.s32.totalorder %s1718_s27, 2 }
 0x1e3   : > { %s953_s11 = scalar_lea.sflag [#allocation4], %s952_s20 }
 0x1e4   : > { %p1441_p13 = pnand %p1961_p10, %p1857_p6 }
 0x1e6   : > { %p1442_p11 = pneg %p1441_p13 }
 0x1e8   : > { %1701 = dma.done.wait (%p1442_p11), %s953_s11, 256  }
 0x1e9   : > { %1703 = vsyncadd (%p1442_p11), %s953_s11, 4294967040  ;;  %p22_p0 = scmp.ge.s32.totalorder %s1827_s14, 4   ;;  %s1962_s24 = smov %s1710_s25 }
 0x1ea   : > { %s1963_s25 = smov %s1714_s26  ;;  %s1964_s26 = smov %s1838_s18 }
 0x1eb   : > { %s1965_s27 = smov %s1827_s14  ;;  %24 = sbr.rel (!%p22_p0) target bundleno = 10 (0xa), region = 109 }
 0x1f0   :  { %959 = vsyncpa [#allocation3], 1 }
 0x1f1   :  { %961 = vsyncpa [#allocation3 + $0x1], 1 }
 0x1f2   :  { %962 = vsyncpa [#allocation6], 1 }
 0x1f3   :  { %963 = vsyncpa [#allocation9], 1 }
 0x1f4   :  { %964 = vsyncpa [#allocation4], 1 }
 0x1f5   :  { %966 = vsyncpa [#allocation4 + $0x1], 1 }

</bundles_post_ra>
